<compile_context>
chip_gen: v5e
topology: v5e:2x2
jax: 0.10.0
libtpu: 0.0.40
codegen_flags: <defaults>
</compile_context>

<pallas_src>
import math
import functools

import jax
import jax.numpy as jnp
from jax.experimental import pallas as pl
from jax.experimental.pallas import tpu as pltpu


def _round_up(x, m):
    return (x + m - 1) // m * m


def _largest_divisor_leq(n, cap):
    for d in range(min(n, cap), 0, -1):
        if n % d == 0:
            return d
    return 1


def _urlstm_recurrent_kernel(gx_ref, h0_ref, c0_ref, wh_ref, fb_ref,
                             y_ref, hn_ref, cn_ref, h_s, c_s):
    """Recurrent part only. gx_ref already holds x@Wi^T + (bi+bh)."""
    t = pl.program_id(1)

    # Load initial state into the VMEM carry at the first time chunk of each
    # batch tile (time axis iterates innermost).
    @pl.when(t == 0)
    def _():
        h_s[...] = h0_ref[...].astype(jnp.float32)
        c_s[...] = c0_ref[...].astype(jnp.float32)

    Bb, Hp = h_s.shape
    Tc = gx_ref.shape[0]

    wh = wh_ref[...]                                           # (Hp, 4Hp) bf16
    # Hoist the broadcast out of the unrolled loop (no CSE of broadcast_in_dim).
    fb = jnp.broadcast_to(fb_ref[...], (Bb, Hp)).astype(jnp.float32)

    def step(i, carry):
        h_prev, c_prev = carry                                 # f32 (Bb, Hp)
        gates = gx_ref[i] + jnp.dot(
            h_prev.astype(jnp.bfloat16), wh,
            preferred_element_type=jnp.float32)                # (Bb, 4Hp) f32
        fg = gates[:, 0 * Hp:1 * Hp]
        rg = gates[:, 1 * Hp:2 * Hp]
        cg = gates[:, 2 * Hp:3 * Hp]
        og = gates[:, 3 * Hp:4 * Hp]

        f = jax.nn.sigmoid(fg + fb)
        r = jax.nn.sigmoid(rg - fb)
        g = jnp.tanh(cg)
        o = jax.nn.sigmoid(og)

        # effective_gate = 2rf + (1-2r)f^2  ==  f * (2r(1-f) + f)
        e = f * (2.0 * r * (1.0 - f) + f)
        cy = e * c_prev + (1.0 - e) * g
        hy = o * jnp.tanh(cy)

        y_ref[i] = hy.astype(y_ref.dtype)
        return hy, cy

    h_fin, c_fin = jax.lax.fori_loop(
        0, Tc, step, (h_s[...], c_s[...]), unroll=True)

    h_s[...] = h_fin
    c_s[...] = c_fin

    # Resident outputs: write back only once, on the last time chunk.
    @pl.when(t == pl.num_programs(1) - 1)
    def _():
        hn_ref[...] = h_fin.astype(hn_ref.dtype)
        cn_ref[...] = c_fin.astype(cn_ref.dtype)


def urlstm_layer(x, h0, c0, wi, bi, wh, bh, fb, *,
                 time_chunk=4, max_batch_block=128):
    """Run one URLSTMCell over a full sequence.

    x:  (T, B, In)   h0, c0: (B, H)
    wi: (4H, In)     bi: (4H,)
    wh: (4H, H)      bh: (4H,)
    fb: (H,)
    Returns (y, h_n, c_n) with y: (T, B, H).
    """
    T, B, In = x.shape
    H = h0.shape[1]

    Hp = _round_up(H, 128)                       # lane-aligned hidden size
    Bb = min(max_batch_block, _round_up(B, 8))   # batch tile (sublane-aligned)
    Bp = _round_up(B, Bb)
    Tc = _largest_divisor_leq(T, time_chunk)     # time steps per grid step
    padH = Hp - H

    # --- Pad the gate-structured parameters per gate (zeros are inert). ---
    wi4 = jnp.pad(wi.reshape(4, H, In), ((0, 0), (0, padH), (0, 0)))
    wh4 = jnp.pad(wh.reshape(4, H, H), ((0, 0), (0, padH), (0, padH)))
    b4 = jnp.pad((bi + bh).reshape(4, H), ((0, 0), (0, padH)))
    wi_p = wi4.reshape(4 * Hp, In)               # (4Hp, In)
    wh_p = wh4.reshape(4 * Hp, Hp)               # (4Hp, Hp)
    b_p = b4.reshape(4 * Hp).astype(jnp.float32)
    fb_p = jnp.pad(fb, (0, padH)).reshape(1, Hp).astype(jnp.float32)

    # --- Pad activations / initial state (zero padding keeps recurrence exact). ---
    xp = jnp.pad(x, ((0, 0), (0, Bp - B), (0, 0)))
    h0p = jnp.pad(h0, ((0, Bp - B), (0, padH))).astype(jnp.float32)
    c0p = jnp.pad(c0, ((0, Bp - B), (0, padH))).astype(jnp.float32)

    # --- Hoisted time-parallel input projection: one big bf16 MXU matmul. ---
    gates_x = (jnp.dot(xp.reshape(T * Bp, In).astype(jnp.bfloat16),
                       wi_p.T.astype(jnp.bfloat16),
                       preferred_element_type=jnp.float32)
               + b_p).reshape(T, Bp, 4 * Hp)      # (T, Bp, 4Hp) f32

    wh_t = jnp.transpose(wh_p).astype(jnp.bfloat16)   # (Hp, 4Hp) bf16

    grid = (Bp // Bb, T // Tc)

    # NOTE: for very large H on v7x (64 MiB VMEM), additionally single-buffer
    # the invariant Wh^T block (pipeline_mode=pl.Buffered(1)) and/or tile 4Hp.
    grid_spec = pltpu.PrefetchScalarGridSpec(
        num_scalar_prefetch=0,
        grid=grid,
        in_specs=[
            pl.BlockSpec((Tc, Bb, 4 * Hp), lambda b, t: (t, b, 0)),  # gates_x
            pl.BlockSpec((Bb, Hp), lambda b, t: (b, 0)),             # h0
            pl.BlockSpec((Bb, Hp), lambda b, t: (b, 0)),             # c0
            pl.BlockSpec((Hp, 4 * Hp), lambda b, t: (0, 0)),         # Wh^T (bf16)
            pl.BlockSpec((1, Hp), lambda b, t: (0, 0)),              # forget_bias
        ],
        out_specs=[
            pl.BlockSpec((Tc, Bb, Hp), lambda b, t: (t, b, 0)),      # y
            pl.BlockSpec((Bb, Hp), lambda b, t: (b, 0)),             # h_n (resident)
            pl.BlockSpec((Bb, Hp), lambda b, t: (b, 0)),             # c_n (resident)
        ],
        scratch_shapes=[
            pltpu.VMEM((Bb, Hp), jnp.float32),                       # h carry
            pltpu.VMEM((Bb, Hp), jnp.float32),                       # c carry
        ],
    )

    y, h_n, c_n = pl.pallas_call(
        _urlstm_recurrent_kernel,
        out_shape=(
            jax.ShapeDtypeStruct((T, Bp, Hp), x.dtype),
            jax.ShapeDtypeStruct((Bp, Hp), x.dtype),
            jax.ShapeDtypeStruct((Bp, Hp), x.dtype),
        ),
        grid_spec=grid_spec,
        compiler_params=pltpu.CompilerParams(
            dimension_semantics=("parallel", "arbitrary"),
            vmem_limit_bytes=64 * 1024 * 1024,
        ),
    )(gates_x, h0p, c0p, wh_t, fb_p)

    return y[:, :B, :H], h_n[:B, :H], c_n[:B, :H]


@jax.jit
def urlstm_forward(x, params, h0, c0):
    """Multi-layer URLSTM (batch_first=False, dropout=0.0 eval semantics).

    x:  (T, B, input_size)
    h0, c0: (num_layers, B, H)
    Returns (outputs (T,B,H), (h_n (L,B,H), c_n (L,B,H))).
    """
    out_h, out_c = [], []
    layer_in = x
    for i, p in enumerate(params):
        y, hn, cn = urlstm_layer(layer_in, h0[i], c0[i],
                                 p["wi"], p["bi"], p["wh"], p["bh"], p["fb"])
        # TODO(synk): inter-layer dropout omitted (module default dropout=0.0 / eval).
        layer_in = y
        out_h.append(hn)
        out_c.append(cn)
    return layer_in, (jnp.stack(out_h, 0), jnp.stack(out_c, 0))


def init_urlstm_params(key, input_size, hidden_size, num_layers):
    """Deterministic init mirroring URLSTMCell.reset_parameters."""
    params = []
    stdv = 1.0 / math.sqrt(hidden_size)
    for i in range(num_layers):
        in_sz = input_size if i == 0 else hidden_size
        key, k1, k2, k3, k4, k5 = jax.random.split(key, 6)
        wi = jax.random.uniform(k1, (4 * hidden_size, in_sz),
                                minval=-stdv, maxval=stdv, dtype=jnp.float32)
        bi = jax.random.uniform(k2, (4 * hidden_size,),
                                minval=-stdv, maxval=stdv, dtype=jnp.float32)
        wh = jax.random.uniform(k3, (4 * hidden_size, hidden_size),
                                minval=-stdv, maxval=stdv, dtype=jnp.float32)
        bh = jax.random.uniform(k4, (4 * hidden_size,),
                                minval=-stdv, maxval=stdv, dtype=jnp.float32)
        u = (jax.random.uniform(k5, (hidden_size,), dtype=jnp.float32)
             * (1.0 - 2.0 / hidden_size) + 1.0 / hidden_size)
        fb = -jnp.log(1.0 / u - 1.0)
        params.append(dict(wi=wi, bi=bi, wh=wh, bh=bh, fb=fb))
    return params


def _reference_urlstm(x, params, h0, c0):
    """Pure-JAX f32 reference (lax.scan per layer) for verification."""
    def cell(p, carry, xt):
        h, c = carry
        gates = xt @ p["wi"].T + p["bi"] + h @ p["wh"].T + p["bh"]
        H = h.shape[1]
        fg, rg, cg, og = (gates[:, :H], gates[:, H:2*H],
                          gates[:, 2*H:3*H], gates[:, 3*H:])
        f = jax.nn.sigmoid(fg + p["fb"])
        r = jax.nn.sigmoid(rg - p["fb"])
        g = jnp.tanh(cg)
        o = jax.nn.sigmoid(og)
        e = 2 * r * f + (1 - 2 * r) * f ** 2
        cy = e * c + (1 - e) * g
        hy = o * jnp.tanh(cy)
        return (hy, cy), hy

    outs_h, outs_c = [], []
    layer_in = x
    for i, p in enumerate(params):
        (hn, cn), ys = jax.lax.scan(
            lambda carry, xt: cell(p, carry, xt), (h0[i], c0[i]), layer_in)
        layer_in = ys
        outs_h.append(hn)
        outs_c.append(cn)
    return layer_in, (jnp.stack(outs_h), jnp.stack(outs_c))


if __name__ == "__main__":
    T, B = 8, 2
    input_size, hidden_size, num_layers = 16, 32, 2

    key = jax.random.PRNGKey(0)
    key, kx = jax.random.split(key)
    x = jax.random.normal(kx, (T, B, input_size), dtype=jnp.float32)

    params = init_urlstm_params(key, input_size, hidden_size, num_layers)
    h0 = jnp.zeros((num_layers, B, hidden_size), dtype=jnp.float32)
    c0 = jnp.zeros((num_layers, B, hidden_size), dtype=jnp.float32)

    outputs, (h_n, c_n) = urlstm_forward(x, params, h0, c0)
    jax.block_until_ready((outputs, h_n, c_n))

    ref_out, (ref_h, ref_c) = _reference_urlstm(x, params, h0, c0)
    # bf16 MXU matmuls in the kernel -> loosened tolerance vs. the f32 reference.
    assert outputs.shape == ref_out.shape
    assert jnp.allclose(outputs, ref_out, atol=5e-2, rtol=5e-2)
    assert jnp.allclose(h_n, ref_h, atol=5e-2, rtol=5e-2)
    assert jnp.allclose(c_n, ref_c, atol=5e-2, rtol=5e-2)

    print("KERNEL_OK")
</pallas_src>

<mosaic_0001>
module attributes {stable_mosaic.version = 11 : i64} {
  func.func @_urlstm_recurrent_kernel(%arg0: i32, %arg1: i32, %arg2: memref<4x8x512xf32, #tpu.memory_space<vmem>>, %arg3: memref<8x128xf32, #tpu.memory_space<vmem>>, %arg4: memref<8x128xf32, #tpu.memory_space<vmem>>, %arg5: memref<128x512xbf16, #tpu.memory_space<vmem>>, %arg6: memref<1x128xf32, #tpu.memory_space<vmem>>, %arg7: memref<4x8x128xf32, #tpu.memory_space<vmem>>, %arg8: memref<8x128xf32, #tpu.memory_space<vmem>>, %arg9: memref<8x128xf32, #tpu.memory_space<vmem>>, %arg10: memref<8x128xf32, #tpu.memory_space<vmem>>, %arg11: memref<8x128xf32, #tpu.memory_space<vmem>>) attributes {dimension_semantics = [#tpu.dimension_semantics<parallel>, #tpu.dimension_semantics<arbitrary>], iteration_bounds = array<i64: 1, 2>, scalar_prefetch = 0 : i64, scratch_operands = 2 : i64, tpu.core_type = #tpu.core_type<tc>, window_params = [{transform_indices = @transform_0, window_bounds = array<i64: 4, 8, 512>}, {transform_indices = @transform_1, window_bounds = array<i64: 8, 128>}, {transform_indices = @transform_2, window_bounds = array<i64: 8, 128>}, {pipeline_mode = #tpu.pipeline_mode<synchronous>, transform_indices = @transform_3, window_bounds = array<i64: 128, 512>}, {pipeline_mode = #tpu.pipeline_mode<synchronous>, transform_indices = @transform_4, window_bounds = array<i64: 1, 128>}, {transform_indices = @transform_5, window_bounds = array<i64: 4, 8, 128>}, {transform_indices = @transform_6, window_bounds = array<i64: 8, 128>}, {transform_indices = @transform_7, window_bounds = array<i64: 8, 128>}]} {
    %c0_i32 = arith.constant 0 : i32
    %0 = arith.cmpi eq, %arg1, %c0_i32 : i32
    %1 = arith.extui %0 : i1 to i32
    %c0_i32_0 = arith.constant 0 : i32
    %2 = arith.cmpi ne, %1, %c0_i32_0 : i32
    scf.if %2 {
      %c0_58 = arith.constant 0 : index
      %c0_59 = arith.constant 0 : index
      %198 = vector.load %arg3[%c0_58, %c0_59] : memref<8x128xf32, #tpu.memory_space<vmem>>, vector<8x128xf32>
      %c0_60 = arith.constant 0 : index
      %c0_61 = arith.constant 0 : index
      %199 = vector.load %arg10[%c0_60, %c0_61] : memref<8x128xf32, #tpu.memory_space<vmem>>, vector<8x128xf32>
      tpu.vector_store %arg10[%c0_60, %c0_61], %198 {strides = array<i32>} : memref<8x128xf32, #tpu.memory_space<vmem>>, vector<8x128xf32>,
      %c0_62 = arith.constant 0 : index
      %c0_63 = arith.constant 0 : index
      %200 = vector.load %arg4[%c0_62, %c0_63] : memref<8x128xf32, #tpu.memory_space<vmem>>, vector<8x128xf32>
      %c0_64 = arith.constant 0 : index
      %c0_65 = arith.constant 0 : index
      %201 = vector.load %arg11[%c0_64, %c0_65] : memref<8x128xf32, #tpu.memory_space<vmem>>, vector<8x128xf32>
      tpu.vector_store %arg11[%c0_64, %c0_65], %200 {strides = array<i32>} : memref<8x128xf32, #tpu.memory_space<vmem>>, vector<8x128xf32>,
    } else {
    }
    %c0 = arith.constant 0 : index
    %c0_1 = arith.constant 0 : index
    %3 = vector.load %arg5[%c0, %c0_1] : memref<128x512xbf16, #tpu.memory_space<vmem>>, vector<128x512xbf16>
    %c0_2 = arith.constant 0 : index
    %c0_3 = arith.constant 0 : index
    %4 = vector.load %arg6[%c0_2, %c0_3] : memref<1x128xf32, #tpu.memory_space<vmem>>, vector<1x128xf32>
    %5 = vector.shape_cast %4 : vector<1x128xf32> to vector<1x128xf32>
    %6 = vector.broadcast %5 : vector<1x128xf32> to vector<8x128xf32>
    %c0_4 = arith.constant 0 : index
    %c0_5 = arith.constant 0 : index
    %7 = vector.load %arg10[%c0_4, %c0_5] : memref<8x128xf32, #tpu.memory_space<vmem>>, vector<8x128xf32>
    %c0_6 = arith.constant 0 : index
    %c0_7 = arith.constant 0 : index
    %8 = vector.load %arg11[%c0_6, %c0_7] : memref<8x128xf32, #tpu.memory_space<vmem>>, vector<8x128xf32>
    %c0_i32_8 = arith.constant 0 : i32
    %9 = arith.index_cast %c0_i32_8 : i32 to index
    %c0_9 = arith.constant 0 : index
    %c0_10 = arith.constant 0 : index
    %10 = vector.load %arg2[%9, %c0_9, %c0_10] : memref<4x8x512xf32, #tpu.memory_space<vmem>>, vector<1x8x512xf32>
    %11 = vector.shape_cast %10 : vector<1x8x512xf32> to vector<8x512xf32>
    %12 = arith.truncf %7 : vector<8x128xf32> to vector<8x128xbf16>
    %cst = arith.constant dense<0.000000e+00> : vector<8x512xf32>
    %13 = tpu.matmul %12, %3, %cst {dimension_numbers = #tpu.dot_dimension_numbers<[1], [0], [0], [1], [0, 0, 1, 1], [], []>} : vector<8x128xbf16>, vector<128x512xbf16>, vector<8x512xf32> -> vector<8x512xf32>
    %14 = arith.addf %11, %13 : vector<8x512xf32>
    %15 = vector.extract_strided_slice %14 {offsets = [0, 0], sizes = [8, 128], strides = [1, 1]} : vector<8x512xf32> to vector<8x128xf32>
    %16 = vector.extract_strided_slice %14 {offsets = [0, 128], sizes = [8, 128], strides = [1, 1]} : vector<8x512xf32> to vector<8x128xf32>
    %17 = vector.extract_strided_slice %14 {offsets = [0, 256], sizes = [8, 128], strides = [1, 1]} : vector<8x512xf32> to vector<8x128xf32>
    %18 = vector.extract_strided_slice %14 {offsets = [0, 384], sizes = [8, 128], strides = [1, 1]} : vector<8x512xf32> to vector<8x128xf32>
    %19 = arith.addf %15, %6 : vector<8x128xf32>
    %20 = arith.negf %19 : vector<8x128xf32>
    %21 = math.exp %20 : vector<8x128xf32>
    %cst_11 = arith.constant 1.000000e+00 : f32
    %22 = vector.broadcast %cst_11 : f32 to vector<8x128xf32>
    %23 = arith.addf %22, %21 : vector<8x128xf32>
    %24 = arith.divf %22, %23 : vector<8x128xf32>
    %25 = arith.subf %16, %6 : vector<8x128xf32>
    %26 = arith.negf %25 : vector<8x128xf32>
    %27 = math.exp %26 : vector<8x128xf32>
    %cst_12 = arith.constant 1.000000e+00 : f32
    %28 = vector.broadcast %cst_12 : f32 to vector<8x128xf32>
    %29 = arith.addf %28, %27 : vector<8x128xf32>
    %30 = arith.divf %28, %29 : vector<8x128xf32>
    %31 = math.tanh %17 : vector<8x128xf32>
    %32 = arith.negf %18 : vector<8x128xf32>
    %33 = math.exp %32 : vector<8x128xf32>
    %cst_13 = arith.constant 1.000000e+00 : f32
    %34 = vector.broadcast %cst_13 : f32 to vector<8x128xf32>
    %35 = arith.addf %34, %33 : vector<8x128xf32>
    %36 = arith.divf %34, %35 : vector<8x128xf32>
    %cst_14 = arith.constant 2.000000e+00 : f32
    %37 = vector.broadcast %cst_14 : f32 to vector<8x128xf32>
    %38 = arith.mulf %37, %30 : vector<8x128xf32>
    %cst_15 = arith.constant 1.000000e+00 : f32
    %39 = vector.broadcast %cst_15 : f32 to vector<8x128xf32>
    %40 = arith.subf %39, %24 : vector<8x128xf32>
    %41 = arith.mulf %38, %40 : vector<8x128xf32>
    %42 = arith.addf %41, %24 : vector<8x128xf32>
    %43 = arith.mulf %24, %42 : vector<8x128xf32>
    %44 = arith.mulf %43, %8 : vector<8x128xf32>
    %cst_16 = arith.constant 1.000000e+00 : f32
    %45 = vector.broadcast %cst_16 : f32 to vector<8x128xf32>
    %46 = arith.subf %45, %43 : vector<8x128xf32>
    %47 = arith.mulf %46, %31 : vector<8x128xf32>
    %48 = arith.addf %44, %47 : vector<8x128xf32>
    %49 = math.tanh %48 : vector<8x128xf32>
    %50 = arith.mulf %36, %49 : vector<8x128xf32>
    %51 = arith.index_cast %c0_i32_8 : i32 to index
    %c0_17 = arith.constant 0 : index
    %c0_18 = arith.constant 0 : index
    %52 = vector.load %arg7[%51, %c0_17, %c0_18] : memref<4x8x128xf32, #tpu.memory_space<vmem>>, vector<1x8x128xf32>
    %53 = vector.shape_cast %52 : vector<1x8x128xf32> to vector<8x128xf32>
    %54 = vector.shape_cast %50 : vector<8x128xf32> to vector<1x8x128xf32>
    tpu.vector_store %arg7[%51, %c0_17, %c0_18], %54 {strides = array<i32>} : memref<4x8x128xf32, #tpu.memory_space<vmem>>, vector<1x8x128xf32>,
    %c1_i32 = arith.constant 1 : i32
    %55 = arith.index_cast %c1_i32 : i32 to index
    %c0_19 = arith.constant 0 : index
    %c0_20 = arith.constant 0 : index
    %56 = vector.load %arg2[%55, %c0_19, %c0_20] : memref<4x8x512xf32, #tpu.memory_space<vmem>>, vector<1x8x512xf32>
    %57 = vector.shape_cast %56 : vector<1x8x512xf32> to vector<8x512xf32>
    %58 = arith.truncf %50 : vector<8x128xf32> to vector<8x128xbf16>
    %cst_21 = arith.constant dense<0.000000e+00> : vector<8x512xf32>
    %59 = tpu.matmul %58, %3, %cst_21 {dimension_numbers = #tpu.dot_dimension_numbers<[1], [0], [0], [1], [0, 0, 1, 1], [], []>} : vector<8x128xbf16>, vector<128x512xbf16>, vector<8x512xf32> -> vector<8x512xf32>
    %60 = arith.addf %57, %59 : vector<8x512xf32>
    %61 = vector.extract_strided_slice %60 {offsets = [0, 0], sizes = [8, 128], strides = [1, 1]} : vector<8x512xf32> to vector<8x128xf32>
    %62 = vector.extract_strided_slice %60 {offsets = [0, 128], sizes = [8, 128], strides = [1, 1]} : vector<8x512xf32> to vector<8x128xf32>
    %63 = vector.extract_strided_slice %60 {offsets = [0, 256], sizes = [8, 128], strides = [1, 1]} : vector<8x512xf32> to vector<8x128xf32>
    %64 = vector.extract_strided_slice %60 {offsets = [0, 384], sizes = [8, 128], strides = [1, 1]} : vector<8x512xf32> to vector<8x128xf32>
    %65 = arith.addf %61, %6 : vector<8x128xf32>
    %66 = arith.negf %65 : vector<8x128xf32>
    %67 = math.exp %66 : vector<8x128xf32>
    %cst_22 = arith.constant 1.000000e+00 : f32
    %68 = vector.broadcast %cst_22 : f32 to vector<8x128xf32>
    %69 = arith.addf %68, %67 : vector<8x128xf32>
    %70 = arith.divf %68, %69 : vector<8x128xf32>
    %71 = arith.subf %62, %6 : vector<8x128xf32>
    %72 = arith.negf %71 : vector<8x128xf32>
    %73 = math.exp %72 : vector<8x128xf32>
    %cst_23 = arith.constant 1.000000e+00 : f32
    %74 = vector.broadcast %cst_23 : f32 to vector<8x128xf32>
    %75 = arith.addf %74, %73 : vector<8x128xf32>
    %76 = arith.divf %74, %75 : vector<8x128xf32>
    %77 = math.tanh %63 : vector<8x128xf32>
    %78 = arith.negf %64 : vector<8x128xf32>
    %79 = math.exp %78 : vector<8x128xf32>
    %cst_24 = arith.constant 1.000000e+00 : f32
    %80 = vector.broadcast %cst_24 : f32 to vector<8x128xf32>
    %81 = arith.addf %80, %79 : vector<8x128xf32>
    %82 = arith.divf %80, %81 : vector<8x128xf32>
    %cst_25 = arith.constant 2.000000e+00 : f32
    %83 = vector.broadcast %cst_25 : f32 to vector<8x128xf32>
    %84 = arith.mulf %83, %76 : vector<8x128xf32>
    %cst_26 = arith.constant 1.000000e+00 : f32
    %85 = vector.broadcast %cst_26 : f32 to vector<8x128xf32>
    %86 = arith.subf %85, %70 : vector<8x128xf32>
    %87 = arith.mulf %84, %86 : vector<8x128xf32>
    %88 = arith.addf %87, %70 : vector<8x128xf32>
    %89 = arith.mulf %70, %88 : vector<8x128xf32>
    %90 = arith.mulf %89, %48 : vector<8x128xf32>
    %cst_27 = arith.constant 1.000000e+00 : f32
    %91 = vector.broadcast %cst_27 : f32 to vector<8x128xf32>
    %92 = arith.subf %91, %89 : vector<8x128xf32>
    %93 = arith.mulf %92, %77 : vector<8x128xf32>
    %94 = arith.addf %90, %93 : vector<8x128xf32>
    %95 = math.tanh %94 : vector<8x128xf32>
    %96 = arith.mulf %82, %95 : vector<8x128xf32>
    %97 = arith.index_cast %c1_i32 : i32 to index
    %c0_28 = arith.constant 0 : index
    %c0_29 = arith.constant 0 : index
    %98 = vector.load %arg7[%97, %c0_28, %c0_29] : memref<4x8x128xf32, #tpu.memory_space<vmem>>, vector<1x8x128xf32>
    %99 = vector.shape_cast %98 : vector<1x8x128xf32> to vector<8x128xf32>
    %100 = vector.shape_cast %96 : vector<8x128xf32> to vector<1x8x128xf32>
    tpu.vector_store %arg7[%97, %c0_28, %c0_29], %100 {strides = array<i32>} : memref<4x8x128xf32, #tpu.memory_space<vmem>>, vector<1x8x128xf32>,
    %c2_i32 = arith.constant 2 : i32
    %101 = arith.index_cast %c2_i32 : i32 to index
    %c0_30 = arith.constant 0 : index
    %c0_31 = arith.constant 0 : index
    %102 = vector.load %arg2[%101, %c0_30, %c0_31] : memref<4x8x512xf32, #tpu.memory_space<vmem>>, vector<1x8x512xf32>
    %103 = vector.shape_cast %102 : vector<1x8x512xf32> to vector<8x512xf32>
    %104 = arith.truncf %96 : vector<8x128xf32> to vector<8x128xbf16>
    %cst_32 = arith.constant dense<0.000000e+00> : vector<8x512xf32>
    %105 = tpu.matmul %104, %3, %cst_32 {dimension_numbers = #tpu.dot_dimension_numbers<[1], [0], [0], [1], [0, 0, 1, 1], [], []>} : vector<8x128xbf16>, vector<128x512xbf16>, vector<8x512xf32> -> vector<8x512xf32>
    %106 = arith.addf %103, %105 : vector<8x512xf32>
    %107 = vector.extract_strided_slice %106 {offsets = [0, 0], sizes = [8, 128], strides = [1, 1]} : vector<8x512xf32> to vector<8x128xf32>
    %108 = vector.extract_strided_slice %106 {offsets = [0, 128], sizes = [8, 128], strides = [1, 1]} : vector<8x512xf32> to vector<8x128xf32>
    %109 = vector.extract_strided_slice %106 {offsets = [0, 256], sizes = [8, 128], strides = [1, 1]} : vector<8x512xf32> to vector<8x128xf32>
    %110 = vector.extract_strided_slice %106 {offsets = [0, 384], sizes = [8, 128], strides = [1, 1]} : vector<8x512xf32> to vector<8x128xf32>
    %111 = arith.addf %107, %6 : vector<8x128xf32>
    %112 = arith.negf %111 : vector<8x128xf32>
    %113 = math.exp %112 : vector<8x128xf32>
    %cst_33 = arith.constant 1.000000e+00 : f32
    %114 = vector.broadcast %cst_33 : f32 to vector<8x128xf32>
    %115 = arith.addf %114, %113 : vector<8x128xf32>
    %116 = arith.divf %114, %115 : vector<8x128xf32>
    %117 = arith.subf %108, %6 : vector<8x128xf32>
    %118 = arith.negf %117 : vector<8x128xf32>
    %119 = math.exp %118 : vector<8x128xf32>
    %cst_34 = arith.constant 1.000000e+00 : f32
    %120 = vector.broadcast %cst_34 : f32 to vector<8x128xf32>
    %121 = arith.addf %120, %119 : vector<8x128xf32>
    %122 = arith.divf %120, %121 : vector<8x128xf32>
    %123 = math.tanh %109 : vector<8x128xf32>
    %124 = arith.negf %110 : vector<8x128xf32>
    %125 = math.exp %124 : vector<8x128xf32>
    %cst_35 = arith.constant 1.000000e+00 : f32
    %126 = vector.broadcast %cst_35 : f32 to vector<8x128xf32>
    %127 = arith.addf %126, %125 : vector<8x128xf32>
    %128 = arith.divf %126, %127 : vector<8x128xf32>
    %cst_36 = arith.constant 2.000000e+00 : f32
    %129 = vector.broadcast %cst_36 : f32 to vector<8x128xf32>
    %130 = arith.mulf %129, %122 : vector<8x128xf32>
    %cst_37 = arith.constant 1.000000e+00 : f32
    %131 = vector.broadcast %cst_37 : f32 to vector<8x128xf32>
    %132 = arith.subf %131, %116 : vector<8x128xf32>
    %133 = arith.mulf %130, %132 : vector<8x128xf32>
    %134 = arith.addf %133, %116 : vector<8x128xf32>
    %135 = arith.mulf %116, %134 : vector<8x128xf32>
    %136 = arith.mulf %135, %94 : vector<8x128xf32>
    %cst_38 = arith.constant 1.000000e+00 : f32
    %137 = vector.broadcast %cst_38 : f32 to vector<8x128xf32>
    %138 = arith.subf %137, %135 : vector<8x128xf32>
    %139 = arith.mulf %138, %123 : vector<8x128xf32>
    %140 = arith.addf %136, %139 : vector<8x128xf32>
    %141 = math.tanh %140 : vector<8x128xf32>
    %142 = arith.mulf %128, %141 : vector<8x128xf32>
    %143 = arith.index_cast %c2_i32 : i32 to index
    %c0_39 = arith.constant 0 : index
    %c0_40 = arith.constant 0 : index
    %144 = vector.load %arg7[%143, %c0_39, %c0_40] : memref<4x8x128xf32, #tpu.memory_space<vmem>>, vector<1x8x128xf32>
    %145 = vector.shape_cast %144 : vector<1x8x128xf32> to vector<8x128xf32>
    %146 = vector.shape_cast %142 : vector<8x128xf32> to vector<1x8x128xf32>
    tpu.vector_store %arg7[%143, %c0_39, %c0_40], %146 {strides = array<i32>} : memref<4x8x128xf32, #tpu.memory_space<vmem>>, vector<1x8x128xf32>,
    %c3_i32 = arith.constant 3 : i32
    %147 = arith.index_cast %c3_i32 : i32 to index
    %c0_41 = arith.constant 0 : index
    %c0_42 = arith.constant 0 : index
    %148 = vector.load %arg2[%147, %c0_41, %c0_42] : memref<4x8x512xf32, #tpu.memory_space<vmem>>, vector<1x8x512xf32>
    %149 = vector.shape_cast %148 : vector<1x8x512xf32> to vector<8x512xf32>
    %150 = arith.truncf %142 : vector<8x128xf32> to vector<8x128xbf16>
    %cst_43 = arith.constant dense<0.000000e+00> : vector<8x512xf32>
    %151 = tpu.matmul %150, %3, %cst_43 {dimension_numbers = #tpu.dot_dimension_numbers<[1], [0], [0], [1], [0, 0, 1, 1], [], []>} : vector<8x128xbf16>, vector<128x512xbf16>, vector<8x512xf32> -> vector<8x512xf32>
    %152 = arith.addf %149, %151 : vector<8x512xf32>
    %153 = vector.extract_strided_slice %152 {offsets = [0, 0], sizes = [8, 128], strides = [1, 1]} : vector<8x512xf32> to vector<8x128xf32>
    %154 = vector.extract_strided_slice %152 {offsets = [0, 128], sizes = [8, 128], strides = [1, 1]} : vector<8x512xf32> to vector<8x128xf32>
    %155 = vector.extract_strided_slice %152 {offsets = [0, 256], sizes = [8, 128], strides = [1, 1]} : vector<8x512xf32> to vector<8x128xf32>
    %156 = vector.extract_strided_slice %152 {offsets = [0, 384], sizes = [8, 128], strides = [1, 1]} : vector<8x512xf32> to vector<8x128xf32>
    %157 = arith.addf %153, %6 : vector<8x128xf32>
    %158 = arith.negf %157 : vector<8x128xf32>
    %159 = math.exp %158 : vector<8x128xf32>
    %cst_44 = arith.constant 1.000000e+00 : f32
    %160 = vector.broadcast %cst_44 : f32 to vector<8x128xf32>
    %161 = arith.addf %160, %159 : vector<8x128xf32>
    %162 = arith.divf %160, %161 : vector<8x128xf32>
    %163 = arith.subf %154, %6 : vector<8x128xf32>
    %164 = arith.negf %163 : vector<8x128xf32>
    %165 = math.exp %164 : vector<8x128xf32>
    %cst_45 = arith.constant 1.000000e+00 : f32
    %166 = vector.broadcast %cst_45 : f32 to vector<8x128xf32>
    %167 = arith.addf %166, %165 : vector<8x128xf32>
    %168 = arith.divf %166, %167 : vector<8x128xf32>
    %169 = math.tanh %155 : vector<8x128xf32>
    %170 = arith.negf %156 : vector<8x128xf32>
    %171 = math.exp %170 : vector<8x128xf32>
    %cst_46 = arith.constant 1.000000e+00 : f32
    %172 = vector.broadcast %cst_46 : f32 to vector<8x128xf32>
    %173 = arith.addf %172, %171 : vector<8x128xf32>
    %174 = arith.divf %172, %173 : vector<8x128xf32>
    %cst_47 = arith.constant 2.000000e+00 : f32
    %175 = vector.broadcast %cst_47 : f32 to vector<8x128xf32>
    %176 = arith.mulf %175, %168 : vector<8x128xf32>
    %cst_48 = arith.constant 1.000000e+00 : f32
    %177 = vector.broadcast %cst_48 : f32 to vector<8x128xf32>
    %178 = arith.subf %177, %162 : vector<8x128xf32>
    %179 = arith.mulf %176, %178 : vector<8x128xf32>
    %180 = arith.addf %179, %162 : vector<8x128xf32>
    %181 = arith.mulf %162, %180 : vector<8x128xf32>
    %182 = arith.mulf %181, %140 : vector<8x128xf32>
    %cst_49 = arith.constant 1.000000e+00 : f32
    %183 = vector.broadcast %cst_49 : f32 to vector<8x128xf32>
    %184 = arith.subf %183, %181 : vector<8x128xf32>
    %185 = arith.mulf %184, %169 : vector<8x128xf32>
    %186 = arith.addf %182, %185 : vector<8x128xf32>
    %187 = math.tanh %186 : vector<8x128xf32>
    %188 = arith.mulf %174, %187 : vector<8x128xf32>
    %189 = arith.index_cast %c3_i32 : i32 to index
    %c0_50 = arith.constant 0 : index
    %c0_51 = arith.constant 0 : index
    %190 = vector.load %arg7[%189, %c0_50, %c0_51] : memref<4x8x128xf32, #tpu.memory_space<vmem>>, vector<1x8x128xf32>
    %191 = vector.shape_cast %190 : vector<1x8x128xf32> to vector<8x128xf32>
    %192 = vector.shape_cast %188 : vector<8x128xf32> to vector<1x8x128xf32>
    tpu.vector_store %arg7[%189, %c0_50, %c0_51], %192 {strides = array<i32>} : memref<4x8x128xf32, #tpu.memory_space<vmem>>, vector<1x8x128xf32>,
    %c4_i32 = arith.constant 4 : i32
    %c0_52 = arith.constant 0 : index
    %c0_53 = arith.constant 0 : index
    %193 = vector.load %arg10[%c0_52, %c0_53] : memref<8x128xf32, #tpu.memory_space<vmem>>, vector<8x128xf32>
    tpu.vector_store %arg10[%c0_52, %c0_53], %188 {strides = array<i32>} : memref<8x128xf32, #tpu.memory_space<vmem>>, vector<8x128xf32>,
    %c0_54 = arith.constant 0 : index
    %c0_55 = arith.constant 0 : index
    %194 = vector.load %arg11[%c0_54, %c0_55] : memref<8x128xf32, #tpu.memory_space<vmem>>, vector<8x128xf32>
    tpu.vector_store %arg11[%c0_54, %c0_55], %186 {strides = array<i32>} : memref<8x128xf32, #tpu.memory_space<vmem>>, vector<8x128xf32>,
    %c1_i32_56 = arith.constant 1 : i32
    %195 = arith.cmpi eq, %arg1, %c1_i32_56 : i32
    %196 = arith.extui %195 : i1 to i32
    %c0_i32_57 = arith.constant 0 : i32
    %197 = arith.cmpi ne, %196, %c0_i32_57 : i32
    scf.if %197 {
      %c0_58 = arith.constant 0 : index
      %c0_59 = arith.constant 0 : index
      %198 = vector.load %arg8[%c0_58, %c0_59] : memref<8x128xf32, #tpu.memory_space<vmem>>, vector<8x128xf32>
      tpu.vector_store %arg8[%c0_58, %c0_59], %188 {strides = array<i32>} : memref<8x128xf32, #tpu.memory_space<vmem>>, vector<8x128xf32>,
      %c0_60 = arith.constant 0 : index
      %c0_61 = arith.constant 0 : index
      %199 = vector.load %arg9[%c0_60, %c0_61] : memref<8x128xf32, #tpu.memory_space<vmem>>, vector<8x128xf32>
      tpu.vector_store %arg9[%c0_60, %c0_61], %186 {strides = array<i32>} : memref<8x128xf32, #tpu.memory_space<vmem>>, vector<8x128xf32>,
    } else {
    }
    return
  }
  func.func @transform_0(%arg0: i32, %arg1: i32) -> (i32, i32, i32) {
    %c0_i32 = arith.constant 0 : i32
    %c0_i32_0 = arith.constant 0 : i32
    return %arg1, %arg0, %c0_i32 : i32, i32, i32
  }
  func.func @transform_1(%arg0: i32, %arg1: i32) -> (i32, i32) {
    %c0_i32 = arith.constant 0 : i32
    %c0_i32_0 = arith.constant 0 : i32
    return %arg0, %c0_i32 : i32, i32
  }
  func.func @transform_2(%arg0: i32, %arg1: i32) -> (i32, i32) {
    %c0_i32 = arith.constant 0 : i32
    %c0_i32_0 = arith.constant 0 : i32
    return %arg0, %c0_i32 : i32, i32
  }
  func.func @transform_3(%arg0: i32, %arg1: i32) -> (i32, i32) {
    %c0_i32 = arith.constant 0 : i32
    %c0_i32_0 = arith.constant 0 : i32
    %c0_i32_1 = arith.constant 0 : i32
    return %c0_i32, %c0_i32_0 : i32, i32
  }
  func.func @transform_4(%arg0: i32, %arg1: i32) -> (i32, i32) {
    %c0_i32 = arith.constant 0 : i32
    %c0_i32_0 = arith.constant 0 : i32
    %c0_i32_1 = arith.constant 0 : i32
    return %c0_i32, %c0_i32_0 : i32, i32
  }
  func.func @transform_5(%arg0: i32, %arg1: i32) -> (i32, i32, i32) {
    %c0_i32 = arith.constant 0 : i32
    %c0_i32_0 = arith.constant 0 : i32
    return %arg1, %arg0, %c0_i32 : i32, i32, i32
  }
  func.func @transform_6(%arg0: i32, %arg1: i32) -> (i32, i32) {
    %c0_i32 = arith.constant 0 : i32
    %c0_i32_0 = arith.constant 0 : i32
    return %arg0, %c0_i32 : i32, i32
  }
  func.func @transform_7(%arg0: i32, %arg1: i32) -> (i32, i32) {
    %c0_i32 = arith.constant 0 : i32
    %c0_i32_0 = arith.constant 0 : i32
    return %arg0, %c0_i32 : i32, i32
  }
}

</mosaic_0001>

<bundles_post_ra>
// kernel: urlstm_forward.2
= control target key start
LH: loop header
LB: loop body
LE: loop exit
PB: predicated region body
PF: predicated region fallthrough
CT: control target
= control target key end

     0   :  { %s1655_s24 = smov 0   ;;  %s1657_s25 = smov 0   ;;  %s2138_s0 = inlined_call_operand.vmem [shape: f32[8,8,512], index: 0, kind: input, shape index: {}]   ;;  %s2139_s1 = inlined_call_operand.vmem [shape: f32[8,128], index: 1, kind: input, shape index: {}]   ;;  %s2140_s2 = inlined_call_operand.vmem [shape: f32[8,128], index: 2, kind: input, shape index: {}]   ;;  %s2141_s3 = inlined_call_operand.vmem [shape: bf16[128,512], index: 3, kind: input, shape index: {}]   ;;  %s2142_s4 = inlined_call_operand.vmem [shape: f32[1,128], index: 4, kind: input, shape index: {}]   ;;  %s2143_s5 = inlined_call_operand.vmem [shape: f32[8,8,128], index: 5, kind: output, shape index: {0}]   ;;  %s2144_s6 = inlined_call_operand.vmem [shape: f32[8,128], index: 6, kind: output, shape index: {1}]   ;;  %s2145_s7 = inlined_call_operand.vmem [shape: f32[8,128], index: 7, kind: output, shape index: {2}]  }
   0x1   :  { %s1659_s26 = smov 0  }
   0x2 LB: > { %s27_s27 = sadd.s32 1, %s1609_s25  ;;  %p1302_p0 = scmp.ge.s32.totalorder %s1613_s26, 1  ;;  %s1613_s26 = sphi %s1659_s26, %s18_s26   ;;  %s1609_s25 = sphi %s1657_s25, %s2147_s25   ;;  %s1605_s24 = sphi %s1655_s24, %s2146_s24  }
   0x3   : > { %p28_p1 = scmp.ge.s32.totalorder %s27_s27, 2  ;;  %p282_p2 = scmp.lt.s32.totalorder %s1613_s26, 3 }
   0x5   : > { %s2149_s27 = smov (%p28_p1, %s27_s27), 0  ;;  %p283_p3 = pnand %p1302_p0, %p282_p2 }
   0x6   : > { %s1303_s28 = sshll.u32 (!%p283_p3), %s1605_s24, 2  ;;  %p1308_p5 = scmp.ne.s32.totalorder (!%p283_p3), %s1605_s24, 0 }
   0x7   : > { %286 = sbr.rel (%p283_p3) target bundleno = 792 (0x318), region = 40  ;;  %p339_p4 = scmp.lt.s32.totalorder (!%p283_p3), %s1303_s28, 7 }
   0xc   : > { %s2151_s28 = smov (!%p339_p4, %s1303_s28), 7  ;;  %377 = sbr.rel (%p1308_p5) target bundleno = 20 (0x14), region = 44 }
   0xd   : > { %s1469_s29 = sshll.u32 %s2151_s28, 5  ;;  %s1307_s30 = sshll.u32 %s2151_s28, 3 }
   0xe   : > { %s1679_s10 = scalar_lea.vmem %s2138_s0, %s1469_s29  ;;  %s1684_s13 = scalar_lea.vmem %s2143_s5, %s1307_s30 }
  0x11   : > { %v378_v0 = vld [vmem:[%s2139_s1] sm:$0xff] }
  0x12   : > { %v380_v1 = vld [vmem:[%s2140_s2] sm:$0xff]  ;;  %379 = vst [vmem:[#allocation2] sm:$0xff] %v378_v0 }
  0x13   : > { %381 = vst [vmem:[#allocation3] sm:$0xff] %v380_v1 }
  0x14 PF: > { %v1423_v2 = vld [vmem:[%s2141_s3 + $0xe0] sm:$0xf]  ;;  %v1500_v3 = vld [vmem:[%s2141_s3 + $0xec] sm:$0xf0]  ;;  %v1498_v4 = vld [vmem:[%s2141_s3 + $0xe4] sm:$0xf] }
  0x15   : > { %v1702_v5 = vor.u32 %v1500_v3, %v1423_v2  ;;  %v1425_v6 = vld [vmem:[%s2141_s3 + $0xf0] sm:$0xf0]  ;;  %v1407_v7 = vld [vmem:[%s2141_s3 + $0xc0] sm:$0xf]  ;;  %v1496_v8 = vld [vmem:[%s2141_s3 + $0xcc] sm:$0xf0] }
  0x16   : > { %v1713_v9 = vor.u32 %v1498_v4, %v1425_v6  ;;  %v1494_v10 = vld [vmem:[%s2141_s3 + $0xc4] sm:$0xf]  ;;  %v1409_v11 = vld [vmem:[%s2141_s3 + $0xd0] sm:$0xf0]  ;;  %v1499_v12 = vld [vmem:[%s2141_s3 + $0xec] sm:$0xf]  ;;  %v1725_v13 = vor.u32 %v1496_v8, %v1407_v7 }
  0x17   : > { %585 = vmatpush.bf16.msra.mxu0 %v1702_v5  ;;  %v1433_v14 = vld [vmem:[%s2141_s3 + $0xf8] sm:$0xf0]  ;;  %v1731_v15 = vor.u32 %v1494_v10, %v1409_v11  ;;  %v1391_v17 = vld [vmem:[%s2141_s3 + $0xa0] sm:$0xf]  ;;  %v1492_v18 = vld [vmem:[%s2141_s3 + $0xac] sm:$0xf0] }
  0x18   : > { %598 = vmatpush.bf16.msra.mxu1 %v1713_v9  ;;  %v1733_v16 = vor.u32 %v1499_v12, %v1433_v14  ;;  %v1495_v19 = vld [vmem:[%s2141_s3 + $0xcc] sm:$0xf]  ;;  %v1490_v20 = vld [vmem:[%s2141_s3 + $0xa4] sm:$0xf]  ;;  %v1393_v21 = vld [vmem:[%s2141_s3 + $0xb0] sm:$0xf0]  ;;  %v1757_v24 = vor.u32 %v1492_v18, %v1391_v17 }
  0x19   : > { %v1417_v22 = vld [vmem:[%s2141_s3 + $0xd8] sm:$0xf0]  ;;  %v1491_v25 = vld [vmem:[%s2141_s3 + $0xac] sm:$0xf]  ;;  %v1766_v27 = vor.u32 %v1490_v20, %v1393_v21  ;;  %v1375_v28 = vld [vmem:[%s2141_s3 + $0x80] sm:$0xf] }
  0x1a   : > { %624 = vmatpush.bf16.msra.mxu3 %v1733_v16  ;;  %v1754_v23 = vor.u32 %v1495_v19, %v1417_v22  ;;  %v1401_v26 = vld [vmem:[%s2141_s3 + $0xb8] sm:$0xf0]  ;;  %v1488_v29 = vld [vmem:[%s2141_s3 + $0x8c] sm:$0xf0]  ;;  %v1486_v30 = vld [vmem:[%s2141_s3 + $0x84] sm:$0xf] }
  0x1b   : > { %586 = vmatpush.bf16.msra.mxu0 %v1725_v13  ;;  %v1377_v31 = vld [vmem:[%s2141_s3 + $0x90] sm:$0xf0]  ;;  %v1431_v32 = vld [vmem:[%s2141_s3 + $0xe8] sm:$0xf]  ;;  %v1501_v33 = vld [vmem:[%s2141_s3 + $0xf4] sm:$0xf0]  ;;  %v1787_v34 = vor.u32 %v1491_v25, %v1401_v26  ;;  %v1792_v36 = vor.u32 %v1488_v29, %v1375_v28 }
  0x1c   : > { %599 = vmatpush.bf16.msra.mxu1 %v1731_v15  ;;  %v1789_v35 = vor.u32 %v1501_v33, %v1431_v32  ;;  %v1359_v37 = vld [vmem:[%s2141_s3 + $0x60] sm:$0xf]  ;;  %v1487_v38 = vld [vmem:[%s2141_s3 + $0x8c] sm:$0xf]  ;;  %v1385_v39 = vld [vmem:[%s2141_s3 + $0x98] sm:$0xf0]  ;;  %v1804_v40 = vor.u32 %v1486_v30, %v1377_v31 }
  0x1d   : > { %v1484_v41 = vld [vmem:[%s2141_s3 + $0x6c] sm:$0xf0]  ;;  %v1415_v42 = vld [vmem:[%s2141_s3 + $0xc8] sm:$0xf]  ;;  %v1497_v43 = vld [vmem:[%s2141_s3 + $0xd4] sm:$0xf0]  ;;  %v1825_v47 = vor.u32 %v1487_v38, %v1385_v39 }
  0x1e   : > { %625 = vmatpush.bf16.msra.mxu3 %v1754_v23  ;;  %611 = vmatpush.bf16.msra.mxu2 %v1789_v35  ;;  %v1482_v44 = vld [vmem:[%s2141_s3 + $0x64] sm:$0xf]  ;;  %v1361_v45 = vld [vmem:[%s2141_s3 + $0x70] sm:$0xf0]  ;;  %v1822_v46 = vor.u32 %v1497_v43, %v1415_v42  ;;  %v1399_v48 = vld [vmem:[%s2141_s3 + $0xa8] sm:$0xf]  ;;  %v1831_v49 = vor.u32 %v1484_v41, %v1359_v37 }
  0x1f   : > { %587 = vmatpush.bf16.msra.mxu0 %v1757_v24  ;;  %v1483_v50 = vld [vmem:[%s2141_s3 + $0x6c] sm:$0xf]  ;;  %v1369_v51 = vld [vmem:[%s2141_s3 + $0x78] sm:$0xf0]  ;;  %v1493_v52 = vld [vmem:[%s2141_s3 + $0xb4] sm:$0xf0]  ;;  %v1843_v53 = vor.u32 %v1482_v44, %v1361_v45 }
  0x20   : > { %600 = vmatpush.bf16.msra.mxu1 %v1766_v27  ;;  %v1343_v54 = vld [vmem:[%s2141_s3 + $0x40] sm:$0xf]  ;;  %v1480_v55 = vld [vmem:[%s2141_s3 + $0x4c] sm:$0xf0]  ;;  %v1852_v56 = vor.u32 %v1493_v52, %v1399_v48  ;;  %v1478_v57 = vld [vmem:[%s2141_s3 + $0x44] sm:$0xf]  ;;  %v1864_v60 = vor.u32 %v1483_v50, %v1369_v51 }
  0x21   : > { %v1345_v58 = vld [vmem:[%s2141_s3 + $0x50] sm:$0xf0]  ;;  %v1383_v59 = vld [vmem:[%s2141_s3 + $0x88] sm:$0xf]  ;;  %v1489_v61 = vld [vmem:[%s2141_s3 + $0x94] sm:$0xf0]  ;;  %v1870_v62 = vor.u32 %v1480_v55, %v1343_v54 }
  0x22   : > { %626 = vmatpush.bf16.msra.mxu3 %v1787_v34  ;;  %612 = vmatpush.bf16.msra.mxu2 %v1822_v46  ;;  %v1327_v63 = vld [vmem:[%s2141_s3 + $0x20] sm:$0xf]  ;;  %v1479_v0 = vld [vmem:[%s2141_s3 + $0x4c] sm:$0xf]  ;;  %v1353_v1 = vld [vmem:[%s2141_s3 + $0x58] sm:$0xf0]  ;;  %v1882_v2 = vor.u32 %v1478_v57, %v1345_v58  ;;  %v1894_v7 = vor.u32 %v1489_v61, %v1383_v59 }
  0x23   : > { %588 = vmatpush.bf16.msra.mxu0 %v1792_v36  ;;  %v1476_v3 = vld [vmem:[%s2141_s3 + $0x2c] sm:$0xf0]  ;;  %v1474_v4 = vld [vmem:[%s2141_s3 + $0x24] sm:$0xf]  ;;  %v1329_v6 = vld [vmem:[%s2141_s3 + $0x30] sm:$0xf0]  ;;  %v1903_v11 = vor.u32 %v1479_v0, %v1353_v1 }
  0x24   : > { %601 = vmatpush.bf16.msra.mxu1 %v1804_v40  ;;  %v1367_v8 = vld [vmem:[%s2141_s3 + $0x68] sm:$0xf]  ;;  %v1485_v10 = vld [vmem:[%s2141_s3 + $0x74] sm:$0xf0]  ;;  %v1906_v12 = vor.u32 %v1476_v3, %v1327_v63  ;;  %v1475_v14 = vld [vmem:[%s2141_s3 + $0x2c] sm:$0xf]  ;;  %v1915_v18 = vor.u32 %v1474_v4, %v1329_v6 }
  0x25   : > { %v1337_v17 = vld [vmem:[%s2141_s3 + $0x38] sm:$0xf0]  ;;  %v1311_v19 = vld [vmem:[%s2141_s3] sm:$0xf]  ;;  %v1472_v20 = vld [vmem:[%s2141_s3 + $0xc] sm:$0xf0]  ;;  %v1927_v22 = vor.u32 %v1485_v10, %v1367_v8 }
  0x26   : > { %627 = vmatpush.bf16.msra.mxu3 %v1825_v47  ;;  %613 = vmatpush.bf16.msra.mxu2 %v1852_v56  ;;  %v1470_v21 = vld [vmem:[%s2141_s3 + $0x4] sm:$0xf]  ;;  %v1313_v25 = vld [vmem:[%s2141_s3 + $0x10] sm:$0xf0]  ;;  %v1351_v26 = vld [vmem:[%s2141_s3 + $0x48] sm:$0xf]  ;;  %v1939_v29 = vor.u32 %v1475_v14, %v1337_v17  ;;  %v1942_v30 = vor.u32 %v1472_v20, %v1311_v19 }
  0x27   : > { %589 = vmatpush.bf16.msra.mxu0 %v1831_v49  ;;  %v1481_v28 = vld [vmem:[%s2141_s3 + $0x54] sm:$0xf0]  ;;  %v418_v31 = vld [vmem:[#allocation2] sm:$0xff]  ;;  %v1471_v32 = vld [vmem:[%s2141_s3 + $0xc] sm:$0xf]  ;;  %v1951_v37 = vor.u32 %v1470_v21, %v1313_v25  ;;  %p1464_p6 = scmp.ne.s32.totalorder %s1605_s24, 1 }
  0x28   : > { %602 = vmatpush.bf16.msra.mxu1 %v1843_v53  ;;  %v1321_v33 = vld [vmem:[%s2141_s3 + $0x18] sm:$0xf0]  ;;  %v1954_v38 = vor.u32 %v1481_v28, %v1351_v26  ;;  %v1335_v39 = vld [vmem:[%s2141_s3 + $0x28] sm:$0xf]  ;;  %v1477_v41 = vld [vmem:[%s2141_s3 + $0x34] sm:$0xf0]  ;;  %v424_v42 = vpack.c.bf16 %v418_v31, %v418_v31 }
  0x29   : > { %v1963_v43 = vor.u32 %v1471_v32, %v1321_v33  ;;  %v1968_v44 = vor.u32 %v1477_v41, %v1335_v39  ;;  %v1319_v45 = vld [vmem:[%s2141_s3 + $0x8] sm:$0xf]  ;;  %v1473_v48 = vld [vmem:[%s2141_s3 + $0x14] sm:$0xf0]  ;;  %v420_v51 = vld [vmem:[%s1679_s10] sm:$0xff] }
  0x2a   : > { %628 = vmatpush.bf16.msra.mxu3 %v1864_v60  ;;  %614 = vmatpush.bf16.msra.mxu2 %v1894_v7  ;;  %v1981_v50 = vor.u32 %v1473_v48, %v1319_v45  ;;  %v2049_v52 = vld [vmem:[%s2142_s4] ss:$0 sm:$0xff]  ;;  %v421_v54 = vld [vmem:[%s1679_s10 + $0x8] sm:$0xff]  ;;  %v423_v3 = vld [vmem:[%s1679_s10 + $0x18] sm:$0xff] }
  0x2b   : > { %590 = vmatpush.bf16.msra.mxu0 %v1870_v62 }
  0x2c   : > { %603 = vmatpush.bf16.msra.mxu1 %v1882_v2 }
  0x2e   : > { %629 = vmatpush.bf16.msra.mxu3 %v1903_v11  ;;  %615 = vmatpush.bf16.msra.mxu2 %v1927_v22 }
  0x2f   : > { %591 = vmatpush.bf16.msra.mxu0 %v1906_v12 }
  0x30   : > { %604 = vmatpush.bf16.msra.mxu1 %v1915_v18 }
  0x32   : > { %630 = vmatpush.bf16.msra.mxu3 %v1939_v29  ;;  %616 = vmatpush.bf16.msra.mxu2 %v1954_v38 }
  0x33   : > { %592 = vmatpush.bf16.msra.mxu0 %v1942_v30 }
  0x34   : > { %605 = vmatpush.bf16.msra.mxu1 %v1951_v37 }
  0x36   : > { %593 = vmatmul.bf16.vlgmr.msra.gmra.mxu0 %v424_v42  ;;  %631 = vmatpush.bf16.msra.mxu3 %v1963_v43 }
  0x37   : > { %719 = vmatpush.bf16.msrb.mxu0 %v1702_v5  ;;  %606 = vmatmul.bf16.vlgmr.msra.gmra.mxu1 %v424_v42 }
  0x38   : > { %732 = vmatpush.bf16.msrb.mxu1 %v1713_v9  ;;  %617 = vmatpush.bf16.msra.mxu2 %v1968_v44 }
  0x39   : > { %632 = vmatmul.bf16.vlgmr.msra.gmra.mxu3 %v424_v42 }
  0x3a   : > { %758 = vmatpush.bf16.msrb.mxu3 %v1733_v16 }
  0x3b   : > { %720 = vmatpush.bf16.msrb.mxu0 %v1725_v13 }
  0x3c   : > { %733 = vmatpush.bf16.msrb.mxu1 %v1731_v15  ;;  %618 = vmatpush.bf16.msra.mxu2 %v1981_v50 }
  0x3e   : > { %759 = vmatpush.bf16.msrb.mxu3 %v1754_v23 }
  0x3f   : > { %721 = vmatpush.bf16.msrb.mxu0 %v1757_v24  ;;  %619 = vmatmul.bf16.vlgmr.msra.gmra.mxu2 %v424_v42 }
  0x40   : > { %745 = vmatpush.bf16.msrb.mxu2 %v1789_v35  ;;  %734 = vmatpush.bf16.msrb.mxu1 %v1766_v27 }
  0x42   : > { %760 = vmatpush.bf16.msrb.mxu3 %v1787_v34 }
  0x43   : > { %722 = vmatpush.bf16.msrb.mxu0 %v1792_v36 }
  0x44   : > { %746 = vmatpush.bf16.msrb.mxu2 %v1822_v46  ;;  %735 = vmatpush.bf16.msrb.mxu1 %v1804_v40 }
  0x46   : > { %761 = vmatpush.bf16.msrb.mxu3 %v1825_v47 }
  0x47   : > { %723 = vmatpush.bf16.msrb.mxu0 %v1831_v49 }
  0x48   : > { %747 = vmatpush.bf16.msrb.mxu2 %v1852_v56  ;;  %736 = vmatpush.bf16.msrb.mxu1 %v1843_v53 }
  0x4a   : > { %762 = vmatpush.bf16.msrb.mxu3 %v1864_v60 }
  0x4b   : > { %724 = vmatpush.bf16.msrb.mxu0 %v1870_v62 }
  0x4c   : > { %748 = vmatpush.bf16.msrb.mxu2 %v1894_v7  ;;  %737 = vmatpush.bf16.msrb.mxu1 %v1882_v2 }
  0x4e   : > { %763 = vmatpush.bf16.msrb.mxu3 %v1903_v11 }
  0x4f   : > { %725 = vmatpush.bf16.msrb.mxu0 %v1906_v12 }
  0x50   : > { %749 = vmatpush.bf16.msrb.mxu2 %v1927_v22  ;;  %738 = vmatpush.bf16.msrb.mxu1 %v1915_v18 }
  0x52   : > { %764 = vmatpush.bf16.msrb.mxu3 %v1939_v29 }
  0x53   : > { %726 = vmatpush.bf16.msrb.mxu0 %v1942_v30 }
  0x54   : > { %750 = vmatpush.bf16.msrb.mxu2 %v1954_v38  ;;  %739 = vmatpush.bf16.msrb.mxu1 %v1951_v37 }
  0x56   : > { %765 = vmatpush.bf16.msrb.mxu3 %v1963_v43 }
  0x57   : > { %854 = vmatpush.bf16.msra.mxu0 %v1702_v5 }
  0x58   : > { %867 = vmatpush.bf16.msra.mxu1 %v1713_v9  ;;  %751 = vmatpush.bf16.msrb.mxu2 %v1968_v44 }
  0x5a   : > { %893 = vmatpush.bf16.msra.mxu3 %v1733_v16 }
  0x5b   : > { %855 = vmatpush.bf16.msra.mxu0 %v1725_v13 }
  0x5c   : > { %868 = vmatpush.bf16.msra.mxu1 %v1731_v15  ;;  %752 = vmatpush.bf16.msrb.mxu2 %v1981_v50 }
  0x5e   : > { %894 = vmatpush.bf16.msra.mxu3 %v1754_v23 }
  0x5f   : > { %856 = vmatpush.bf16.msra.mxu0 %v1757_v24 }
  0x60   : > { %880 = vmatpush.bf16.msra.mxu2 %v1789_v35  ;;  %869 = vmatpush.bf16.msra.mxu1 %v1766_v27 }
  0x62   : > { %895 = vmatpush.bf16.msra.mxu3 %v1787_v34 }
  0x63   : > { %857 = vmatpush.bf16.msra.mxu0 %v1792_v36 }
  0x64   : > { %881 = vmatpush.bf16.msra.mxu2 %v1822_v46  ;;  %870 = vmatpush.bf16.msra.mxu1 %v1804_v40 }
  0x66   : > { %896 = vmatpush.bf16.msra.mxu3 %v1825_v47 }
  0x67   : > { %858 = vmatpush.bf16.msra.mxu0 %v1831_v49 }
  0x68   : > { %882 = vmatpush.bf16.msra.mxu2 %v1852_v56  ;;  %871 = vmatpush.bf16.msra.mxu1 %v1843_v53 }
  0x6a   : > { %897 = vmatpush.bf16.msra.mxu3 %v1864_v60 }
  0x6b   : > { %859 = vmatpush.bf16.msra.mxu0 %v1870_v62 }
  0x6c   : > { %883 = vmatpush.bf16.msra.mxu2 %v1894_v7  ;;  %872 = vmatpush.bf16.msra.mxu1 %v1882_v2 }
  0x6e   : > { %898 = vmatpush.bf16.msra.mxu3 %v1903_v11 }
  0x6f   : > { %860 = vmatpush.bf16.msra.mxu0 %v1906_v12 }
  0x70   : > { %884 = vmatpush.bf16.msra.mxu2 %v1927_v22  ;;  %873 = vmatpush.bf16.msra.mxu1 %v1915_v18 }
  0x72   : > { %899 = vmatpush.bf16.msra.mxu3 %v1939_v29 }
  0x73   : > { %861 = vmatpush.bf16.msra.mxu0 %v1942_v30 }
  0x74   : > { %885 = vmatpush.bf16.msra.mxu2 %v1954_v38  ;;  %874 = vmatpush.bf16.msra.mxu1 %v1951_v37 }
  0x76   : > { %900 = vmatpush.bf16.msra.mxu3 %v1963_v43 }
  0x78   : > { %886 = vmatpush.bf16.msra.mxu2 %v1968_v44 }
  0x7c   : > { %887 = vmatpush.bf16.msra.mxu2 %v1981_v50 }
  0xb3   : > { %v594_v55 = vpop.f32.mrf.mxu0 }
  0xb4   : > { %v637_v57 = vadd.f32 %v594_v55, %v420_v51  ;;  %v607_v58 = vpop.f32.mrf.mxu1 }
  0xb5   : > { %v638_v59 = vadd.f32 %v607_v58, %v421_v54 }
  0xb6   : > { %v641_v61 = vadd.f32 %v2049_v52, %v637_v57 }
  0xb7   : > { %v661_v63 = vsub.f32 %v638_v59, %v2049_v52 }
  0xb8   : > { %v1437_v0 = vmul.f32 -1.442695, %v641_v61  ;;  %v422_v61 = vld [vmem:[%s1679_s10 + $0x10] sm:$0xff] }
  0xb9   : > { %v1438_v1 = vmul.f32 -1.442695, %v661_v63 }
  0xba   : > { %1527 = vpow2.f32 %v1437_v0 }
  0xbb   : > { %1529 = vpow2.f32 %v1438_v1  ;;  %v596_v4 = vpop.f32.mrf.mxu0 }
  0xbc   : > { %v609_v6 = vpop.f32.mrf.mxu1  ;;  %v633_v8 = vpop.f32.mrf.mxu3 }
  0xbd   : > { %v640_v10 = vadd.f32 %v633_v8, %v423_v3 }
  0xbf   : > { %v1439_v14 = vmul.f32 -1.442695, %v640_v10 }
  0xc0   : > { %v1528_v17 = vpop.eup %1527 }
  0xc1   : > { %v1530_v19 = vpop.eup %1529  ;;  %v645_v20 = vadd.f32 1.0, %v1528_v17  ;;  %1531 = vpow2.f32 %v1439_v14 }
  0xc2   : > { %v665_v21 = vadd.f32 1.0, %v1530_v19  ;;  %v620_v25 = vpop.f32.mrf.mxu2 }
  0xc3   : > { %1533 = vrcp.f32 %v645_v20  ;;  %v657_v48 = vand.u32 2147483648, %v645_v20  ;;  %v655_v57 = vand.u32 2147483647, %v645_v20  ;;  %vm651_vm2 = vweird.f32 %v645_v20 }
  0xc4   : > { %1535 = vrcp.f32 %v665_v21  ;;  %v635_v26 = vpop.f32.mrf.mxu3  ;;  %v677_v55 = vand.u32 2147483648, %v665_v21  ;;  %v675_v59 = vand.u32 2147483647, %v665_v21  ;;  %vm671_vm3 = vweird.f32 %v665_v21 }
  0xc5   : > { %v658_v0 = vor.u32 1.1754944e-38, %v657_v48  ;;  %v639_v4 = vadd.f32 %v620_v25, %v422_v61  ;;  %vm656_vm6 = vcmp.eq.f32.partialorder %v655_v57, 8.507059e+37 }
  0xc6   : > { %v678_v3 = vor.u32 1.1754944e-38, %v677_v55  ;;  %vm676_vm7 = vcmp.eq.f32.partialorder %v675_v59, 8.507059e+37 }
  0xc7   : > { %v1532_v28 = vpop.eup %1531 }
  0xc8   : > { %v685_v32 = vadd.f32 1.0, %v1532_v28 }
  0xc9   : > { %v1534_v31 = vpop.eup %1533 }
  0xca   : > { %v1536_v33 = vpop.eup %1535  ;;  %v647_v39 = vmul.f32 %v1534_v31, %v645_v20  ;;  %v622_v41 = vpop.f32.mrf.mxu2  ;;  %1537 = vrcp.f32 %v685_v32  ;;  %vm652_vm0 = vweird.f32 %v1534_v31  ;;  %vm691_vm8 = vweird.f32 %v685_v32 }
  0xcb   : > { %v667_v42 = vmul.f32 %v1536_v33, %v665_v21  ;;  %vm672_vm1 = vweird.f32 %v1536_v33  ;;  %vm653_vm4 = vmor %vm651_vm2, %vm652_vm0  ;;  %1539 = vtanh.f32 %v639_v4  ;;  %v695_v57 = vand.u32 2147483647, %v685_v32 }
  0xcc   : > { %v648_v45 = vsub.f32 1.0, %v647_v39  ;;  %vm673_vm5 = vmor %vm671_vm3, %vm672_vm1 }
  0xcd   : > { %v668_v51 = vsub.f32 1.0, %v667_v42  ;;  %vm696_vm11 = vcmp.eq.f32.partialorder %v695_v57, 8.507059e+37 }
  0xce   : > { %v649_v54 = vmul.f32 %v1534_v31, %v648_v45  ;;  %v419_v45 = vld [vmem:[#allocation3] sm:$0xff] }
  0xcf   : > { %v669_v58 = vmul.f32 %v1536_v33, %v668_v51 }
  0xd0   : > { %v650_v63 = vadd.f32 %v1534_v31, %v649_v54  ;;  %v1538_v8 = vpop.eup %1537 }
  0xd1   : > { %v670_v1 = vadd.f32 %v1536_v33, %v669_v58  ;;  %v687_v28 = vmul.f32 %v1538_v8, %v685_v32  ;;  %v1540_v21 = vpop.eup %1539  ;;  %vm692_vm9 = vweird.f32 %v1538_v8 }
  0xd2   : > { %v654_v6 = vsel %vm653_vm4, %v1534_v31, %v650_v63  ;;  %vm693_vm10 = vmor %vm691_vm8, %vm692_vm9 }
  0xd3   : > { %v659_v10 = vsel %vm656_vm6, %v658_v0, %v654_v6  ;;  %v674_v14 = vsel %vm673_vm5, %v1536_v33, %v670_v1  ;;  %v688_v41 = vsub.f32 1.0, %v687_v28  ;;  %v697_v33 = vand.u32 2147483648, %v685_v32 }
  0xd4   : > { %v679_v17 = vsel %vm676_vm7, %v678_v3, %v674_v14  ;;  %v702_v19 = vsub.f32 1.0, %v659_v10 }
  0xd5   : > { %v701_v26 = vmul.f32 2.0, %v679_v17  ;;  %v689_v51 = vmul.f32 %v1538_v8, %v688_v41  ;;  %v698_v58 = vor.u32 1.1754944e-38, %v697_v33 }
  0xd7   : > { %v703_v20 = vmul.f32 %v702_v19, %v701_v26  ;;  %v690_v55 = vadd.f32 %v1538_v8, %v689_v51  ;;  %v1442_v19 = vld [vmem:[%s1679_s10 + $0x30] sm:$0xff] }
  0xd9   : > { %v704_v39 = vadd.f32 %v703_v20, %v659_v10  ;;  %v694_v59 = vsel %vm693_vm10, %v1538_v8, %v690_v55 }
  0xda   : > { %v699_v63 = vsel %vm696_vm11, %v698_v58, %v694_v59 }
  0xdb   : > { %v705_v42 = vmul.f32 %v704_v39, %v659_v10 }
  0xdd   : > { %v707_v48 = vsub.f32 1.0, %v705_v42  ;;  %v706_v25 = vmul.f32 %v705_v42, %v419_v45 }
  0xdf   : > { %v708_v31 = vmul.f32 %v1540_v21, %v707_v48 }
  0xe1   : > { %v2056_v54 = vadd.f32 %v708_v31, %v706_v25 }
  0xe3   : > { %1541 = vtanh.f32 %v2056_v54 }
  0xe9   : > { %v1542_v61 = vpop.eup %1541 }
  0xea   : > { %v711_v0 = vmul.f32 %v1542_v61, %v699_v63 }
  0xec   : > { %712 = vst [vmem:[%s1684_s13] sm:$0xff] %v711_v0  ;;  %v718_v1 = vpack.c.bf16 %v711_v0, %v711_v0 }
  0xee   : > { %727 = vmatmul.bf16.vlgmr.msrb.gmra.mxu0 %v718_v1  ;;  %740 = vmatmul.bf16.vlgmr.msrb.gmra.mxu1 %v718_v1 }
  0xef   : > { %753 = vmatmul.bf16.vlgmr.msrb.gmra.mxu2 %v718_v1  ;;  %766 = vmatmul.bf16.vlgmr.msrb.gmra.mxu3 %v718_v1 }
  0xf0   : > { %989 = vmatpush.bf16.msrb.mxu0 %v1702_v5  ;;  %1002 = vmatpush.bf16.msrb.mxu1 %v1713_v9  ;;  %v1440_v5 = vld [vmem:[%s1679_s10 + $0x20] sm:$0xff]  ;;  %v1441_v9 = vld [vmem:[%s1679_s10 + $0x28] sm:$0xff] }
  0xf1   : > { %1015 = vmatpush.bf16.msrb.mxu2 %v1789_v35  ;;  %1028 = vmatpush.bf16.msrb.mxu3 %v1733_v16 }
  0xf4   : > { %990 = vmatpush.bf16.msrb.mxu0 %v1725_v13  ;;  %1003 = vmatpush.bf16.msrb.mxu1 %v1731_v15 }
  0xf5   : > { %1016 = vmatpush.bf16.msrb.mxu2 %v1822_v46  ;;  %1029 = vmatpush.bf16.msrb.mxu3 %v1754_v23 }
  0xf8   : > { %991 = vmatpush.bf16.msrb.mxu0 %v1757_v24  ;;  %1004 = vmatpush.bf16.msrb.mxu1 %v1766_v27 }
  0xf9   : > { %1017 = vmatpush.bf16.msrb.mxu2 %v1852_v56  ;;  %1030 = vmatpush.bf16.msrb.mxu3 %v1787_v34 }
  0xfc   : > { %992 = vmatpush.bf16.msrb.mxu0 %v1792_v36  ;;  %1005 = vmatpush.bf16.msrb.mxu1 %v1804_v40  ;;  %v1443_v36 = vld [vmem:[%s1679_s10 + $0x38] sm:$0xff] }
  0xfd   : > { %1018 = vmatpush.bf16.msrb.mxu2 %v1894_v7  ;;  %1031 = vmatpush.bf16.msrb.mxu3 %v1825_v47 }
 0x100   : > { %993 = vmatpush.bf16.msrb.mxu0 %v1831_v49  ;;  %1006 = vmatpush.bf16.msrb.mxu1 %v1843_v53 }
 0x101   : > { %1019 = vmatpush.bf16.msrb.mxu2 %v1927_v22  ;;  %1032 = vmatpush.bf16.msrb.mxu3 %v1864_v60 }
 0x104   : > { %994 = vmatpush.bf16.msrb.mxu0 %v1870_v62  ;;  %1007 = vmatpush.bf16.msrb.mxu1 %v1882_v2 }
 0x105   : > { %1020 = vmatpush.bf16.msrb.mxu2 %v1954_v38  ;;  %1033 = vmatpush.bf16.msrb.mxu3 %v1903_v11 }
 0x108   : > { %995 = vmatpush.bf16.msrb.mxu0 %v1906_v12  ;;  %1008 = vmatpush.bf16.msrb.mxu1 %v1915_v18 }
 0x109   : > { %1021 = vmatpush.bf16.msrb.mxu2 %v1968_v44  ;;  %1034 = vmatpush.bf16.msrb.mxu3 %v1939_v29 }
 0x10c   : > { %996 = vmatpush.bf16.msrb.mxu0 %v1942_v30  ;;  %1009 = vmatpush.bf16.msrb.mxu1 %v1951_v37 }
 0x10d   : > { %1022 = vmatpush.bf16.msrb.mxu2 %v1981_v50  ;;  %1035 = vmatpush.bf16.msrb.mxu3 %v1963_v43 }
 0x16b   : > { %v728_v13 = vpop.f32.mrf.mxu0  ;;  %v741_v15 = vpop.f32.mrf.mxu1 }
 0x16c   : > { %v771_v16 = vadd.f32 %v1440_v5, %v728_v13  ;;  %v772_v23 = vadd.f32 %v1441_v9, %v741_v15 }
 0x16e   : > { %v775_v24 = vadd.f32 %v2049_v52, %v771_v16  ;;  %v795_v27 = vsub.f32 %v772_v23, %v2049_v52 }
 0x170   : > { %v1444_v34 = vmul.f32 -1.442695, %v775_v24  ;;  %v1445_v35 = vmul.f32 -1.442695, %v795_v27  ;;  %v1448_v27 = vld [vmem:[%s1679_s10 + $0x40] sm:$0xff] }
 0x172   : > { %1543 = vpow2.f32 %v1444_v34  ;;  %v754_v40 = vpop.f32.mrf.mxu2  ;;  %v767_v46 = vpop.f32.mrf.mxu3  ;;  %v1449_v34 = vld [vmem:[%s1679_s10 + $0x48] sm:$0xff] }
 0x173   : > { %1545 = vpow2.f32 %v1445_v35  ;;  %v774_v47 = vadd.f32 %v1443_v36, %v767_v46  ;;  %v730_v49 = vpop.f32.mrf.mxu0  ;;  %v743_v53 = vpop.f32.mrf.mxu1  ;;  %v773_v42 = vadd.f32 %v1442_v19, %v754_v40 }
 0x175   : > { %v1446_v56 = vmul.f32 -1.442695, %v774_v47 }
 0x177   : > { %1547 = vpow2.f32 %v1446_v56 }
 0x178   : > { %v1544_v60 = vpop.eup %1543 }
 0x179   : > { %v1546_v62 = vpop.eup %1545  ;;  %v779_v2 = vadd.f32 1.0, %v1544_v60  ;;  %v1451_v60 = vld [vmem:[%s1679_s10 + $0x58] sm:$0xff] }
 0x17a   : > { %v799_v7 = vadd.f32 1.0, %v1546_v62  ;;  %v756_v11 = vpop.f32.mrf.mxu2  ;;  %v769_v12 = vpop.f32.mrf.mxu3 }
 0x17b   : > { %1549 = vrcp.f32 %v779_v2  ;;  %v791_v44 = vand.u32 2147483648, %v779_v2  ;;  %v789_v4 = vand.u32 2147483647, %v779_v2  ;;  %vm785_vm14 = vweird.f32 %v779_v2 }
 0x17c   : > { %1551 = vrcp.f32 %v799_v7  ;;  %v811_v3 = vand.u32 2147483648, %v799_v7  ;;  %v809_v8 = vand.u32 2147483647, %v799_v7  ;;  %vm805_vm15 = vweird.f32 %v799_v7 }
 0x17d   : > { %v1548_v18 = vpop.eup %1547  ;;  %v792_v14 = vor.u32 1.1754944e-38, %v791_v44  ;;  %vm790_vm2 = vcmp.eq.f32.partialorder %v789_v4, 8.507059e+37 }
 0x17e   : > { %v819_v29 = vadd.f32 1.0, %v1548_v18  ;;  %v812_v26 = vor.u32 1.1754944e-38, %v811_v3  ;;  %vm810_vm3 = vcmp.eq.f32.partialorder %v809_v8, 8.507059e+37 }
 0x180   : > { %1553 = vrcp.f32 %v819_v29  ;;  %v831_v5 = vand.u32 2147483648, %v819_v29  ;;  %vm825_vm5 = vweird.f32 %v819_v29  ;;  %v829_v9 = vand.u32 2147483647, %v819_v29 }
 0x181   : > { %v1550_v22 = vpop.eup %1549  ;;  %1555 = vtanh.f32 %v773_v42 }
 0x182   : > { %v1552_v30 = vpop.eup %1551  ;;  %v781_v37 = vmul.f32 %v1550_v22, %v779_v2  ;;  %vm786_vm12 = vweird.f32 %v1550_v22  ;;  %v832_v15 = vor.u32 1.1754944e-38, %v831_v5  ;;  %vm830_vm7 = vcmp.eq.f32.partialorder %v829_v9, 8.507059e+37 }
 0x183   : > { %v801_v38 = vmul.f32 %v1552_v30, %v799_v7  ;;  %vm806_vm13 = vweird.f32 %v1552_v30  ;;  %vm787_vm0 = vmor %vm785_vm14, %vm786_vm12 }
 0x184   : > { %v782_v43 = vsub.f32 1.0, %v781_v37  ;;  %vm807_vm1 = vmor %vm805_vm15, %vm806_vm13 }
 0x185   : > { %v802_v50 = vsub.f32 1.0, %v801_v38 }
 0x186   : > { %v783_v32 = vmul.f32 %v1550_v22, %v782_v43  ;;  %v1554_v20 = vpop.eup %1553 }
 0x187   : > { %v803_v6 = vmul.f32 %v1552_v30, %v802_v50  ;;  %v821_v51 = vmul.f32 %v1554_v20, %v819_v29  ;;  %v1556_v58 = vpop.eup %1555  ;;  %vm826_vm4 = vweird.f32 %v1554_v20 }
 0x188   : > { %v784_v10 = vadd.f32 %v1550_v22, %v783_v32  ;;  %vm827_vm6 = vmor %vm825_vm5, %vm826_vm4 }
 0x189   : > { %v804_v17 = vadd.f32 %v1552_v30, %v803_v6  ;;  %v822_v33 = vsub.f32 1.0, %v821_v51 }
 0x18a   : > { %v788_v28 = vsel %vm787_vm0, %v1550_v22, %v784_v10 }
 0x18b   : > { %v793_v39 = vsel %vm790_vm2, %v792_v14, %v788_v28  ;;  %v808_v41 = vsel %vm807_vm1, %v1552_v30, %v804_v17  ;;  %v823_v59 = vmul.f32 %v1554_v20, %v822_v33 }
 0x18c   : > { %v813_v21 = vsel %vm810_vm3, %v812_v26, %v808_v41  ;;  %v836_v45 = vsub.f32 1.0, %v793_v39 }
 0x18d   : > { %v835_v48 = vmul.f32 2.0, %v813_v21  ;;  %v824_v1 = vadd.f32 %v1554_v20, %v823_v59  ;;  %v1450_v21 = vld [vmem:[%s1679_s10 + $0x50] sm:$0xff] }
 0x18f   : > { %v837_v25 = vmul.f32 %v836_v45, %v835_v48  ;;  %v828_v13 = vsel %vm827_vm6, %v1554_v20, %v824_v1 }
 0x190   : > { %v833_v23 = vsel %vm830_vm7, %v832_v15, %v828_v13 }
 0x191   : > { %v838_v31 = vadd.f32 %v837_v25, %v793_v39 }
 0x193   : > { %v839_v55 = vmul.f32 %v838_v31, %v793_v39 }
 0x195   : > { %v841_v57 = vsub.f32 1.0, %v839_v55  ;;  %v840_v61 = vmul.f32 %v839_v55, %v2056_v54 }
 0x197   : > { %v842_v63 = vmul.f32 %v1556_v58, %v841_v57 }
 0x199   : > { %v2099_v0 = vadd.f32 %v842_v63, %v840_v61 }
 0x19b   : > { %1557 = vtanh.f32 %v2099_v0 }
 0x1a1   : > { %v1558_v16 = vpop.eup %1557 }
 0x1a2   : > { %v845_v54 = vmul.f32 %v1558_v16, %v833_v23 }
 0x1a4   : > { %1447 = vst [vmem:[%s1684_s13 + $0x8] sm:$0xff] %v845_v54  ;;  %v853_v24 = vpack.c.bf16 %v845_v54, %v845_v54 }
 0x1a6   : > { %862 = vmatmul.bf16.vlgmr.msra.gmra.mxu0 %v853_v24  ;;  %875 = vmatmul.bf16.vlgmr.msra.gmra.mxu1 %v853_v24 }
 0x1a7   : > { %888 = vmatmul.bf16.vlgmr.msra.gmra.mxu2 %v853_v24  ;;  %901 = vmatmul.bf16.vlgmr.msra.gmra.mxu3 %v853_v24 }
 0x223   : > { %v863_v35 = vpop.f32.mrf.mxu0  ;;  %v876_v36 = vpop.f32.mrf.mxu1 }
 0x224   : > { %v906_v40 = vadd.f32 %v1448_v27, %v863_v35  ;;  %v907_v46 = vadd.f32 %v1449_v34, %v876_v36 }
 0x226   : > { %v910_v47 = vadd.f32 %v2049_v52, %v906_v40  ;;  %v930_v49 = vsub.f32 %v907_v46, %v2049_v52 }
 0x228   : > { %v1452_v53 = vmul.f32 -1.442695, %v910_v47  ;;  %v1453_v56 = vmul.f32 -1.442695, %v930_v49  ;;  %v1456_v49 = vld [vmem:[%s1679_s10 + $0x60] sm:$0xff] }
 0x22a   : > { %1559 = vpow2.f32 %v1452_v53  ;;  %v889_v62 = vpop.f32.mrf.mxu2  ;;  %v902_v2 = vpop.f32.mrf.mxu3  ;;  %v1457_v53 = vld [vmem:[%s1679_s10 + $0x68] sm:$0xff] }
 0x22b   : > { %1561 = vpow2.f32 %v1453_v56  ;;  %v909_v7 = vadd.f32 %v1451_v60, %v902_v2  ;;  %v865_v11 = vpop.f32.mrf.mxu0  ;;  %v878_v12 = vpop.f32.mrf.mxu1  ;;  %v908_v33 = vadd.f32 %v1450_v21, %v889_v62 }
 0x22d   : > { %v1454_v18 = vmul.f32 -1.442695, %v909_v7 }
 0x22f   : > { %1563 = vpow2.f32 %v1454_v18 }
 0x230   : > { %v1560_v22 = vpop.eup %1559 }
 0x231   : > { %v1562_v29 = vpop.eup %1561  ;;  %v914_v30 = vadd.f32 1.0, %v1560_v22  ;;  %v1459_v22 = vld [vmem:[%s1679_s10 + $0x78] sm:$0xff] }
 0x232   : > { %v934_v37 = vadd.f32 1.0, %v1562_v29  ;;  %v891_v38 = vpop.f32.mrf.mxu2  ;;  %v904_v43 = vpop.f32.mrf.mxu3 }
 0x233   : > { %1565 = vrcp.f32 %v914_v30  ;;  %v926_v10 = vand.u32 2147483648, %v914_v30  ;;  %v924_v26 = vand.u32 2147483647, %v914_v30  ;;  %vm920_vm10 = vweird.f32 %v914_v30 }
 0x234   : > { %1567 = vrcp.f32 %v934_v37  ;;  %v946_v19 = vand.u32 2147483648, %v934_v37  ;;  %v944_v20 = vand.u32 2147483647, %v934_v37  ;;  %vm940_vm11 = vweird.f32 %v934_v37 }
 0x235   : > { %v1564_v44 = vpop.eup %1563  ;;  %v927_v41 = vor.u32 1.1754944e-38, %v926_v10  ;;  %vm925_vm14 = vcmp.eq.f32.partialorder %v924_v26, 8.507059e+37 }
 0x236   : > { %v954_v32 = vadd.f32 1.0, %v1564_v44  ;;  %v947_v45 = vor.u32 1.1754944e-38, %v946_v19  ;;  %vm945_vm15 = vcmp.eq.f32.partialorder %v944_v20, 8.507059e+37 }
 0x238   : > { %1569 = vrcp.f32 %v954_v32  ;;  %v966_v27 = vand.u32 2147483648, %v954_v32  ;;  %vm960_vm1 = vweird.f32 %v954_v32  ;;  %v964_v34 = vand.u32 2147483647, %v954_v32 }
 0x239   : > { %v1566_v50 = vpop.eup %1565  ;;  %1571 = vtanh.f32 %v908_v33  ;;  %v1458_v33 = vld [vmem:[%s1679_s10 + $0x70] sm:$0xff] }
 0x23a   : > { %v1568_v3 = vpop.eup %1567  ;;  %v916_v4 = vmul.f32 %v1566_v50, %v914_v30  ;;  %vm921_vm8 = vweird.f32 %v1566_v50  ;;  %v967_v36 = vor.u32 1.1754944e-38, %v966_v27  ;;  %vm965_vm3 = vcmp.eq.f32.partialorder %v964_v34, 8.507059e+37 }
 0x23b   : > { %v936_v6 = vmul.f32 %v1568_v3, %v934_v37  ;;  %vm941_vm9 = vweird.f32 %v1568_v3  ;;  %vm922_vm12 = vmor %vm920_vm10, %vm921_vm8 }
 0x23c   : > { %v917_v8 = vsub.f32 1.0, %v916_v4  ;;  %vm942_vm13 = vmor %vm940_vm11, %vm941_vm9 }
 0x23d   : > { %v937_v14 = vsub.f32 1.0, %v936_v6 }
 0x23e   : > { %v918_v17 = vmul.f32 %v1566_v50, %v917_v8  ;;  %v1570_v51 = vpop.eup %1569 }
 0x23f   : > { %v938_v28 = vmul.f32 %v1568_v3, %v937_v14  ;;  %v956_v59 = vmul.f32 %v1570_v51, %v954_v32  ;;  %v1572_v13 = vpop.eup %1571  ;;  %vm961_vm0 = vweird.f32 %v1570_v51 }
 0x240   : > { %v919_v39 = vadd.f32 %v1566_v50, %v918_v17  ;;  %vm962_vm2 = vmor %vm960_vm1, %vm961_vm0 }
 0x241   : > { %v939_v42 = vadd.f32 %v1568_v3, %v938_v28  ;;  %v957_v1 = vsub.f32 1.0, %v956_v59 }
 0x242   : > { %v923_v48 = vsel %vm922_vm12, %v1566_v50, %v919_v39 }
 0x243   : > { %v928_v25 = vsel %vm925_vm14, %v927_v41, %v923_v48  ;;  %v943_v31 = vsel %vm942_vm13, %v1568_v3, %v939_v42  ;;  %v958_v15 = vmul.f32 %v1570_v51, %v957_v1 }
 0x244   : > { %v948_v55 = vsel %vm945_vm15, %v947_v45, %v943_v31  ;;  %v971_v57 = vsub.f32 1.0, %v928_v25 }
 0x245   : > { %v970_v58 = vmul.f32 2.0, %v948_v55  ;;  %v959_v24 = vadd.f32 %v1570_v51, %v958_v15 }
 0x247   : > { %v972_v61 = vmul.f32 %v971_v57, %v970_v58  ;;  %v963_v35 = vsel %vm962_vm2, %v1570_v51, %v959_v24 }
 0x248   : > { %v968_v46 = vsel %vm965_vm3, %v967_v36, %v963_v35 }
 0x249   : > { %v973_v63 = vadd.f32 %v972_v61, %v928_v25 }
 0x24b   : > { %v974_v5 = vmul.f32 %v973_v63, %v928_v25 }
 0x24d   : > { %v976_v9 = vsub.f32 1.0, %v974_v5  ;;  %v975_v16 = vmul.f32 %v974_v5, %v2099_v0 }
 0x24f   : > { %v977_v23 = vmul.f32 %v1572_v13, %v976_v9 }
 0x251   : > { %v2110_v54 = vadd.f32 %v977_v23, %v975_v16 }
 0x253   : > { %1573 = vtanh.f32 %v2110_v54 }
 0x259   : > { %v1574_v40 = vpop.eup %1573 }
 0x25a   : > { %v980_v0 = vmul.f32 %v1574_v40, %v968_v46 }
 0x25c   : > { %1455 = vst [vmem:[%s1684_s13 + $0x10] sm:$0xff] %v980_v0  ;;  %v988_v47 = vpack.c.bf16 %v980_v0, %v980_v0 }
 0x25e   : > { %997 = vmatmul.bf16.vlgmr.msrb.gmra.mxu0 %v988_v47  ;;  %1010 = vmatmul.bf16.vlgmr.msrb.gmra.mxu1 %v988_v47 }
 0x25f   : > { %1023 = vmatmul.bf16.vlgmr.msrb.gmra.mxu2 %v988_v47  ;;  %1036 = vmatmul.bf16.vlgmr.msrb.gmra.mxu3 %v988_v47 }
 0x2db   : > { %v998_v56 = vpop.f32.mrf.mxu0  ;;  %v1011_v60 = vpop.f32.mrf.mxu1 }
 0x2dc   : > { %v1041_v62 = vadd.f32 %v1456_v49, %v998_v56  ;;  %v1042_v2 = vadd.f32 %v1457_v53, %v1011_v60 }
 0x2de   : > { %v1045_v7 = vadd.f32 %v2049_v52, %v1041_v62  ;;  %v1065_v11 = vsub.f32 %v1042_v2, %v2049_v52 }
 0x2e0   : > { %v1460_v12 = vmul.f32 -1.442695, %v1045_v7  ;;  %v1461_v18 = vmul.f32 -1.442695, %v1065_v11 }
 0x2e2   : > { %1575 = vpow2.f32 %v1460_v12  ;;  %v1024_v29 = vpop.f32.mrf.mxu2  ;;  %v1037_v30 = vpop.f32.mrf.mxu3 }
 0x2e3   : > { %1577 = vpow2.f32 %v1461_v18  ;;  %v1044_v37 = vadd.f32 %v1459_v22, %v1037_v30  ;;  %v1000_v38 = vpop.f32.mrf.mxu0  ;;  %v1013_v43 = vpop.f32.mrf.mxu1  ;;  %v1043_v63 = vadd.f32 %v1458_v33, %v1024_v29 }
 0x2e5   : > { %v1462_v44 = vmul.f32 -1.442695, %v1044_v37 }
 0x2e7   : > { %1579 = vpow2.f32 %v1462_v44 }
 0x2e8   : > { %v1576_v50 = vpop.eup %1575 }
 0x2e9   : > { %v1578_v32 = vpop.eup %1577  ;;  %v1049_v3 = vadd.f32 1.0, %v1576_v50 }
 0x2ea   : > { %v1069_v4 = vadd.f32 1.0, %v1578_v32  ;;  %v1026_v6 = vpop.f32.mrf.mxu2  ;;  %v1039_v8 = vpop.f32.mrf.mxu3 }
 0x2eb   : > { %1581 = vrcp.f32 %v1049_v3  ;;  %v1061_v20 = vand.u32 2147483648, %v1049_v3  ;;  %v1059_v21 = vand.u32 2147483647, %v1049_v3  ;;  %vm1055_vm6 = vweird.f32 %v1049_v3 }
 0x2ec   : > { %1583 = vrcp.f32 %v1069_v4  ;;  %v1081_v42 = vand.u32 2147483648, %v1069_v4  ;;  %v1079_v48 = vand.u32 2147483647, %v1069_v4  ;;  %vm1075_vm7 = vweird.f32 %v1069_v4 }
 0x2ed   : > { %v1580_v52 = vpop.eup %1579  ;;  %v1062_v25 = vor.u32 1.1754944e-38, %v1061_v20  ;;  %vm1060_vm10 = vcmp.eq.f32.partialorder %v1059_v21, 8.507059e+37 }
 0x2ee   : > { %v1089_v14 = vadd.f32 1.0, %v1580_v52  ;;  %v1082_v55 = vor.u32 1.1754944e-38, %v1081_v42  ;;  %vm1080_vm11 = vcmp.eq.f32.partialorder %v1079_v48, 8.507059e+37 }
 0x2f0   : > { %1585 = vrcp.f32 %v1089_v14  ;;  %v1101_v47 = vand.u32 2147483648, %v1089_v14  ;;  %vm1095_vm13 = vweird.f32 %v1089_v14  ;;  %v1099_v49 = vand.u32 2147483647, %v1089_v14 }
 0x2f1   : > { %v1582_v10 = vpop.eup %1581  ;;  %1587 = vtanh.f32 %v1043_v63 }
 0x2f2   : > { %v1584_v17 = vpop.eup %1583  ;;  %v1051_v19 = vmul.f32 %v1582_v10, %v1049_v3  ;;  %vm1056_vm4 = vweird.f32 %v1582_v10  ;;  %v1102_v56 = vor.u32 1.1754944e-38, %v1101_v47  ;;  %vm1100_vm15 = vcmp.eq.f32.partialorder %v1099_v49, 8.507059e+37 }
 0x2f3   : > { %v1071_v26 = vmul.f32 %v1584_v17, %v1069_v4  ;;  %vm1076_vm5 = vweird.f32 %v1584_v17  ;;  %vm1057_vm8 = vmor %vm1055_vm6, %vm1056_vm4 }
 0x2f4   : > { %v1052_v28 = vsub.f32 1.0, %v1051_v19  ;;  %vm1077_vm9 = vmor %vm1075_vm7, %vm1076_vm5 }
 0x2f5   : > { %v1072_v39 = vsub.f32 1.0, %v1071_v26 }
 0x2f6   : > { %v1053_v41 = vmul.f32 %v1582_v10, %v1052_v28  ;;  %v1586_v58 = vpop.eup %1585 }
 0x2f7   : > { %v1073_v45 = vmul.f32 %v1584_v17, %v1072_v39  ;;  %v1091_v13 = vmul.f32 %v1586_v58, %v1089_v14  ;;  %v1588_v34 = vpop.eup %1587  ;;  %vm1096_vm12 = vweird.f32 %v1586_v58 }
 0x2f8   : > { %v1054_v51 = vadd.f32 %v1582_v10, %v1053_v41  ;;  %vm1097_vm14 = vmor %vm1095_vm13, %vm1096_vm12 }
 0x2f9   : > { %v1074_v31 = vadd.f32 %v1584_v17, %v1073_v45  ;;  %v1092_v23 = vsub.f32 1.0, %v1091_v13 }
 0x2fa   : > { %v1058_v57 = vsel %vm1057_vm8, %v1582_v10, %v1054_v51 }
 0x2fb   : > { %v1063_v59 = vsel %vm1060_vm10, %v1062_v25, %v1058_v57  ;;  %v1078_v61 = vsel %vm1077_vm9, %v1584_v17, %v1074_v31  ;;  %v1093_v35 = vmul.f32 %v1586_v58, %v1092_v23 }
 0x2fc   : > { %v1083_v1 = vsel %vm1080_vm11, %v1082_v55, %v1078_v61  ;;  %v1106_v5 = vsub.f32 1.0, %v1063_v59 }
 0x2fd   : > { %v1105_v9 = vmul.f32 2.0, %v1083_v1  ;;  %v1094_v0 = vadd.f32 %v1586_v58, %v1093_v35 }
 0x2ff   : > { %v1107_v15 = vmul.f32 %v1106_v5, %v1105_v9  ;;  %v1098_v53 = vsel %vm1097_vm14, %v1586_v58, %v1094_v0 }
 0x300   : > { %v1103_v62 = vsel %vm1100_vm15, %v1102_v56, %v1098_v53 }
 0x301   : > { %v1108_v16 = vadd.f32 %v1107_v15, %v1063_v59 }
 0x303   : > { %v1109_v24 = vmul.f32 %v1108_v16, %v1063_v59 }
 0x305   : > { %v1111_v27 = vsub.f32 1.0, %v1109_v24  ;;  %v1110_v36 = vmul.f32 %v1109_v24, %v2110_v54 }
 0x307   : > { %v1112_v40 = vmul.f32 %v1588_v34, %v1111_v27 }
 0x309   : > { %v1113_v46 = vadd.f32 %v1112_v40, %v1110_v36 }
 0x30b   : > { %1589 = vtanh.f32 %v1113_v46  ;;  %1119 = vst [vmem:[#allocation3] sm:$0xff] %v1113_v46 }
 0x311   : > { %v1590_v60 = vpop.eup %1589  ;;  %1123 = sbr.rel (%p1464_p6) target bundleno = 792 (0x318), region = 48 }
 0x312   : > { %v1115_v2 = vmul.f32 %v1590_v60, %v1103_v62 }
 0x314   : > { %1463 = vst [vmem:[%s1684_s13 + $0x18] sm:$0xff] %v1115_v2 }
 0x315   : > { %1118 = vst [vmem:[#allocation2] sm:$0xff] %v1115_v2 }
 0x316   : > { %1124 = vst [vmem:[%s2144_s6] sm:$0xff] %v1115_v2 }
 0x317   : > { %1125 = vst [vmem:[%s2145_s7] sm:$0xff] %v1113_v46 }
 0x318 PF: > { %s18_s26 = sadd.s32 1, %s1613_s26   ;;  %s2146_s24 = smov %s1609_s25 }
 0x319   : > { %p15_p7 = scmp.ge.s32.totalorder %s18_s26, 4   ;;  %s2147_s25 = smov %s2149_s27 }
 0x31b   :  { %17 = sbr.rel (!%p15_p7) target bundleno = 2 (0x2), region = 114 }

</bundles_post_ra>
